<compile_context>
chip_gen: v7x
topology: tpu7x:2x2x1
jax: 0.10.0
libtpu: 0.0.40
codegen_flags: <defaults>
</compile_context>

<pallas_src>
import functools

import jax
import jax.numpy as jnp
from jax.experimental import pallas as pl
from jax.experimental.pallas import tpu as pltpu


def _round_up(x: int, m: int) -> int:
    return ((x + m - 1) // m) * m


def _integer_power(x, p: int):
    """x**p for a small positive integer p using only VPU multiplies."""
    result = None
    base = x
    while p > 0:
        if p & 1:
            result = base if result is None else result * base
        p >>= 1
        if p:
            base = base * base
    return result


def _vmem_capacity_bytes(default: int = 128 * 1024 * 1024) -> int:
    """Best-effort trace-time VMEM capacity query with a safe fallback."""
    try:
        info = pltpu.get_tpu_info()
        for name in ("vmem_capacity_bytes", "vmem_size_bytes", "vmem_bytes"):
            v = getattr(info, name, None)
            if v:
                return int(v)
    except Exception:
        pass
    return default


def _consistency_kernel(*refs, num_views, inv_temperature, exp_kind, exp_p,
                        use_seg, approx_reciprocal):
    if use_seg:
        probs_ref, seg_ref, out_ref = refs
    else:
        probs_ref, out_ref = refs

    # Mean over the views axis.  Accumulate per-view slices into one (TILE_R, L) f32
    # slab instead of materializing a (K, TILE_R, L) f32 copy (~K x lower peak VMEM).
    acc = probs_ref[0].astype(jnp.float32)
    for k in range(1, num_views):
        acc = acc + probs_ref[k].astype(jnp.float32)
    avg = acc * (1.0 / num_views)                                # (TILE_R, L)

    # Sharpen: integer powers stay on the VPU; half-integer uses one sqrt; the
    # generic path uses EUP exp/log.
    if exp_kind == "int":
        s = _integer_power(avg, exp_p)
    elif exp_kind == "half":                                     # exponent = exp_p/2, odd
        r = jnp.sqrt(avg)
        s = r if exp_p == 1 else _integer_power(avg, (exp_p - 1) // 2) * r
    else:
        s = jnp.exp(jnp.log(avg) * inv_temperature)

    # Per-original-row class sums.
    if use_seg:
        # Block-diagonal ones matrix broadcasts each segment's sum to all its lanes
        # (segmented sum on the otherwise-idle MXU).
        denom = jnp.dot(s, seg_ref[...],
                        preferred_element_type=jnp.float32,
                        precision=jax.lax.Precision.HIGHEST)     # (TILE_R, L)
    else:
        denom = jnp.sum(s, axis=-1, keepdims=True)               # (TILE_R, 1)

    if approx_reciprocal:
        inv = pl.reciprocal(denom, approx=True)
        inv = inv * (2.0 - denom * inv)       # one Newton step removes the vrcp bias
    else:
        inv = pl.reciprocal(denom, approx=False)
    sharpened = s * inv

    diff = sharpened - avg
    # One fused reduction per tile; the mean over N happens in the wrapper.
    out_ref[0, 0] = jnp.sum(diff * diff)


def consistency_loss(probs: jax.Array, temperature: float, *,
                     tile_rows: int | None = None,
                     approx_reciprocal: bool = False,
                     cast_to_bf16: bool = False) -> jax.Array:
    """Pallas implementation of Consistency(temperature)(probs). Returns scalar f32."""
    assert probs.ndim == 3, "expected probs of shape (K, N, C)"
    K, N, C = (int(d) for d in probs.shape)

    if cast_to_bf16 and probs.dtype == jnp.float32:
        # Opt-in: halves HBM bytes (kernel is HBM-bound) at ~1e-3-relative loss error.
        probs = probs.astype(jnp.bfloat16)
    dtype = probs.dtype
    itemsize = jnp.dtype(dtype).itemsize

    # Exponent specialization.
    inv_t = 1.0 / float(temperature)
    p_int = int(round(inv_t))
    p_half = int(round(2.0 * inv_t))
    if abs(inv_t - p_int) < 1e-6 and 1 <= p_int <= 32:
        exp_kind, exp_p = "int", p_int
    elif abs(2.0 * inv_t - p_half) < 1e-6 and 1 <= p_half <= 64:
        exp_kind, exp_p = "half", p_half
    else:
        exp_kind, exp_p = "general", 0

    # Lane packing: fold P = 128 // C original rows into one lane-dense row.
    # L equals the full last dim of the reshaped slab, so any L is a legal block dim.
    P = max(1, 128 // C) if C < 128 else 1
    L = P * C
    R = int(pl.cdiv(N, P))                   # packed rows holding real data

    # Generation-aware tile sizing (biggest block that keeps everything in VMEM).
    vmem_cap = _vmem_capacity_bytes()
    if vmem_cap <= 64 * 1024 * 1024:         # v7x-class: 64 MiB VMEM per core
        block_budget = 7 * 1024 * 1024
        vmem_limit = 48 * 1024 * 1024
    else:                                    # v5e / v6e: 128 MiB VMEM
        block_budget = 10 * 1024 * 1024
        vmem_limit = 96 * 1024 * 1024

    row_bytes_in = K * L * itemsize          # native-dtype HBM bytes per packed row
    row_bytes_f32 = 6 * L * 4                # conservative live f32 intermediates / row
    if tile_rows is None:
        t = block_budget // max(1, row_bytes_in)
        # Guard: 2x double-buffered input + f32 intermediates must fit the VMEM limit.
        t_cap = (vmem_limit - 8 * 1024 * 1024) // max(1, 2 * row_bytes_in + row_bytes_f32)
        tile_rows = min(t, t_cap)
    tile_rows = max(16, (int(tile_rows) // 16) * 16)   # 16-row multiple: f32 & bf16 safe

    # Keep >= 2 (ideally 4) row tiles so v7x's two TensorCores both get work.
    desired_tiles = 4 if R >= 64 else (2 if R >= 32 else 1)
    if desired_tiles > 1:
        tile_rows = min(tile_rows, max(16, _round_up(int(pl.cdiv(R, desired_tiles)), 16)))
    tile_rows = min(tile_rows, _round_up(R, 16))

    num_tiles = int(pl.cdiv(R, tile_rows))
    R_pad = num_tiles * tile_rows
    N_pad = R_pad * P

    # Pad ragged rows with the uniform distribution 1/C: its sharpened value equals
    # its average, so it contributes ~0 loss (exactly 0 when 1/C is representable in
    # `dtype`); the mean divides by the true N.
    if N_pad != N:
        pad = jnp.full((K, N_pad - N, C), 1.0 / C, dtype=dtype)
        probs_p = jnp.concatenate([probs, pad], axis=1)
    else:
        probs_p = probs
    x = probs_p.reshape(K, R_pad, L)         # contiguous, lane-dense slab

    kernel = functools.partial(
        _consistency_kernel,
        num_views=K, inv_temperature=inv_t, exp_kind=exp_kind, exp_p=exp_p,
        use_seg=(P > 1), approx_reciprocal=approx_reciprocal)

    in_specs = [pl.BlockSpec((K, tile_rows, L), lambda i: (0, i, 0))]
    inputs = [x]
    if P > 1:
        li = jax.lax.broadcasted_iota(jnp.int32, (L, L), 0)
        lj = jax.lax.broadcasted_iota(jnp.int32, (L, L), 1)
        seg = (li // C == lj // C).astype(jnp.float32)           # block-diag ones (L, L)
        in_specs.append(pl.BlockSpec((L, L), lambda i: (0, 0)))  # constant index -> one fetch
        inputs.append(seg)

    transcendentals = (0 if exp_kind == "int"
                       else (N_pad * C if exp_kind == "half" else 2 * N_pad * C))
    flops = N_pad * C * (K + 8) + (2 * R_pad * L * L if P > 1 else 0)
    cost = pl.CostEstimate(
        flops=int(flops),
        transcendentals=int(transcendentals),
        bytes_accessed=int(K * N_pad * C * itemsize
                           + (L * L * 4 if P > 1 else 0) + num_tiles * 4))

    partials = pl.pallas_call(
        kernel,
        out_shape=jax.ShapeDtypeStruct((num_tiles, 1), jnp.float32),
        grid=(num_tiles,),
        in_specs=in_specs,
        out_specs=pl.BlockSpec((1, 1), lambda i: (i, 0),
                               memory_space=pltpu.MemorySpace.SMEM),
        compiler_params=pltpu.CompilerParams(
            dimension_semantics=("parallel",),
            vmem_limit_bytes=vmem_limit),
        cost_estimate=cost,
    )(*inputs)

    # Mean over the true number of rows (padding contributed ~zero).
    return jnp.sum(partials) / jnp.float32(N)


def consistency_loss_ref(probs: jax.Array, temperature: float) -> jax.Array:
    """Pure-JAX reference mirroring the PyTorch forward exactly."""
    avg_probs = probs.mean(0)
    sharpened = avg_probs ** (1.0 / temperature)
    sharpened = sharpened / sharpened.sum(-1, keepdims=True)
    return ((sharpened - avg_probs) ** 2).sum(-1).mean()


if __name__ == "__main__":
    key = jax.random.PRNGKey(0)
    T = 0.5

    # 1) Small shape: K views of an (N, C) probability matrix.
    #    Packed-lane path (C=32 -> P=4), integer power (T=0.5), exact reciprocal.
    K, N, C = 4, 8, 32
    logits = jax.random.normal(key, (K, N, C), dtype=jnp.float32)
    probs = jax.nn.softmax(logits, axis=-1)
    loss = jax.block_until_ready(consistency_loss(probs, T))
    ref = consistency_loss_ref(probs, T)
    assert jnp.allclose(loss, ref, rtol=1e-4, atol=1e-7), (loss, ref)

    # 2) Multi-tile + ragged padding + megacore-parallel grid (forced small tiles).
    K2, N2, C2 = 4, 200, 32
    logits2 = jax.random.normal(jax.random.PRNGKey(1), (K2, N2, C2), dtype=jnp.float32)
    probs2 = jax.nn.softmax(logits2, axis=-1)
    loss2 = jax.block_until_ready(consistency_loss(probs2, T, tile_rows=16))
    ref2 = consistency_loss_ref(probs2, T)
    assert jnp.allclose(loss2, ref2, rtol=1e-4, atol=1e-7), (loss2, ref2)

    # 3) bf16 input, generalized packing (C=48 -> P=2, L=96), non-integer exponent
    #    (exp/log path), approximate reciprocal + Newton refinement.
    K3, N3, C3 = 3, 24, 48
    T3 = 0.4
    logits3 = jax.random.normal(jax.random.PRNGKey(2), (K3, N3, C3), dtype=jnp.float32)
    probs3 = jax.nn.softmax(logits3, axis=-1).astype(jnp.bfloat16)
    loss3 = jax.block_until_ready(consistency_loss(probs3, T3, approx_reciprocal=True))
    ref3 = consistency_loss_ref(probs3.astype(jnp.float32), T3)
    assert jnp.allclose(loss3, ref3, rtol=1e-2, atol=1e-6), (loss3, ref3)

    # 4) Unpacked path (C > 128), half-integer exponent (T=2 -> x^0.5 via sqrt).
    K4, N4, C4 = 2, 40, 200
    T4 = 2.0
    logits4 = jax.random.normal(jax.random.PRNGKey(3), (K4, N4, C4), dtype=jnp.float32)
    probs4 = jax.nn.softmax(logits4, axis=-1)
    loss4 = jax.block_until_ready(consistency_loss(probs4, T4))
    ref4 = consistency_loss_ref(probs4, T4)
    assert jnp.allclose(loss4, ref4, rtol=1e-4, atol=1e-7), (loss4, ref4)

    print("KERNEL_OK")
</pallas_src>

<mosaic_0001>
module attributes {stable_mosaic.version = 11 : i64} {
  func.func @_consistency_kernel(%arg0: i32, %arg1: memref<4x16x128xf32, #tpu.memory_space<vmem>>, %arg2: memref<128x128xf32, #tpu.memory_space<vmem>>, %arg3: memref<1x1xf32, #tpu.memory_space<smem>>) attributes {dimension_semantics = [#tpu.dimension_semantics<parallel>], iteration_bounds = array<i64: 1>, scalar_prefetch = 0 : i64, scratch_operands = 0 : i64, tpu.core_type = #tpu.core_type<tc>, window_params = [{transform_indices = @transform_0, window_bounds = array<i64: 4, 16, 128>}, {pipeline_mode = #tpu.pipeline_mode<synchronous>, transform_indices = @transform_1, window_bounds = array<i64: 128, 128>}, {transform_indices = @transform_2, window_bounds = array<i64: 1, 1>}]} {
    %c0 = arith.constant 0 : index
    %c0_0 = arith.constant 0 : index
    %c0_1 = arith.constant 0 : index
    %0 = vector.load %arg1[%c0, %c0_0, %c0_1] : memref<4x16x128xf32, #tpu.memory_space<vmem>>, vector<1x16x128xf32>
    %1 = vector.shape_cast %0 : vector<1x16x128xf32> to vector<16x128xf32>
    %c1 = arith.constant 1 : index
    %c0_2 = arith.constant 0 : index
    %c0_3 = arith.constant 0 : index
    %2 = vector.load %arg1[%c1, %c0_2, %c0_3] : memref<4x16x128xf32, #tpu.memory_space<vmem>>, vector<1x16x128xf32>
    %3 = vector.shape_cast %2 : vector<1x16x128xf32> to vector<16x128xf32>
    %4 = arith.addf %1, %3 : vector<16x128xf32>
    %c2 = arith.constant 2 : index
    %c0_4 = arith.constant 0 : index
    %c0_5 = arith.constant 0 : index
    %5 = vector.load %arg1[%c2, %c0_4, %c0_5] : memref<4x16x128xf32, #tpu.memory_space<vmem>>, vector<1x16x128xf32>
    %6 = vector.shape_cast %5 : vector<1x16x128xf32> to vector<16x128xf32>
    %7 = arith.addf %4, %6 : vector<16x128xf32>
    %c3 = arith.constant 3 : index
    %c0_6 = arith.constant 0 : index
    %c0_7 = arith.constant 0 : index
    %8 = vector.load %arg1[%c3, %c0_6, %c0_7] : memref<4x16x128xf32, #tpu.memory_space<vmem>>, vector<1x16x128xf32>
    %9 = vector.shape_cast %8 : vector<1x16x128xf32> to vector<16x128xf32>
    %10 = arith.addf %7, %9 : vector<16x128xf32>
    %cst = arith.constant 2.500000e-01 : f32
    %11 = vector.broadcast %cst : f32 to vector<16x128xf32>
    %12 = arith.mulf %10, %11 : vector<16x128xf32>
    %13 = arith.mulf %12, %12 : vector<16x128xf32>
    %c0_8 = arith.constant 0 : index
    %c0_9 = arith.constant 0 : index
    %14 = vector.load %arg2[%c0_8, %c0_9] : memref<128x128xf32, #tpu.memory_space<vmem>>, vector<128x128xf32>
    %cst_10 = arith.constant dense<0.000000e+00> : vector<16x128xf32>
    %15 = tpu.matmul %13, %14, %cst_10 {dimension_numbers = #tpu.dot_dimension_numbers<[1], [0], [0], [1], [0, 0, 1, 1], [], []>, precision = #tpu.contract_precision<fp32>} : vector<16x128xf32>, vector<128x128xf32>, vector<16x128xf32> -> vector<16x128xf32>
    %16 = tpu.reciprocal %15 : vector<16x128xf32> -> vector<16x128xf32>
    %17 = arith.mulf %13, %16 : vector<16x128xf32>
    %18 = arith.subf %17, %12 : vector<16x128xf32>
    %19 = arith.mulf %18, %18 : vector<16x128xf32>
    %20 = vector.shape_cast %19 : vector<16x128xf32> to vector<1x16x128xf32>
    %cst_11 = arith.constant dense<0.000000e+00> : vector<1xf32>
    %21 = vector.multi_reduction <add>, %20, %cst_11 [1, 2] : vector<1x16x128xf32> to vector<1xf32>
    %22 = vector.shape_cast %21 : vector<1xf32> to vector<1x1x1xf32>
    %23 = vector.extract %22[0, 0, 0] : f32 from vector<1x1x1xf32>
    %c0_12 = arith.constant 0 : index
    %c0_13 = arith.constant 0 : index
    %24 = memref.load %arg3[%c0_12, %c0_13] : memref<1x1xf32, #tpu.memory_space<smem>>
    memref.store %23, %arg3[%c0_12, %c0_13] : memref<1x1xf32, #tpu.memory_space<smem>>
    return
  }
  func.func @transform_0(%arg0: i32) -> (i32, i32, i32) {
    %c0_i32 = arith.constant 0 : i32
    %c0_i32_0 = arith.constant 0 : i32
    %c0_i32_1 = arith.constant 0 : i32
    return %c0_i32, %arg0, %c0_i32_0 : i32, i32, i32
  }
  func.func @transform_1(%arg0: i32) -> (i32, i32) {
    %c0_i32 = arith.constant 0 : i32
    %c0_i32_0 = arith.constant 0 : i32
    %c0_i32_1 = arith.constant 0 : i32
    return %c0_i32, %c0_i32_0 : i32, i32
  }
  func.func @transform_2(%arg0: i32) -> (i32, i32) {
    %c0_i32 = arith.constant 0 : i32
    %c0_i32_0 = arith.constant 0 : i32
    return %arg0, %c0_i32 : i32, i32
  }
}

</mosaic_0001>

<bundles_post_ra>
// kernel: tpu_custom_call.1
= control target key start
LH: loop header
LB: loop body
LE: loop exit
PB: predicated region body
PF: predicated region fallthrough
CT: control target
= control target key end

     0   :  { %7 = vsyncpa [#allocation3], 0  ;;  %s1741_s0 = inlined_call_operand.hbm [shape: f32[4,16,128], index: 0, kind: input, shape index: {}]   ;;  %s1742_s1 = inlined_call_operand.hbm [shape: f32[128,128], index: 1, kind: input, shape index: {}]   ;;  %s1743_s2 = inlined_call_operand.hbm [shape: f32[1,1], index: 2, kind: output, shape index: {}]  }
   0x1   :  { %8 = vsyncpa [#allocation6], 0 }
   0x2   :  { %9 = vsyncpa [#allocation4], 0  ;;  %s1387_s9 = smov [#allocation2]   ;;  %s1327_s13 = scalar_lea.hbm %s1741_s0, 1024 }
   0x3   :  { %s15_s10 = sshll.u32 %s1387_s9, 4  ;;  %p1328_p0 = scmp.ne.s32.totalorder %s1741_s0, %s1327_s13  ;;  %s16_s10 = int_to_ptr.vmem [resolvable:$true] %s15_s10 }
   0x4   :  { %p1331_p1 = scmp.lt.u32.totalorder %s1327_s13, %s1741_s0 }
   0x6   :  { %p1333_p2 = pnand %p1331_p1, %p1328_p0 }
   0x8   :  { %1336 = shalt.err (!%p1333_p2)
}
   0x9   :  { %s1337_s18 = scalar_lea.vmem %s16_s10, 1024  ;;  %p1342_p4 = scmp.lt.s32.totalorder %s16_s10, %s16_s10 }
   0xa   :  { %p1338_p3 = scmp.ne.s32.totalorder %s16_s10, %s1337_s18  ;;  %p1343_p5 = scmp.lt.s32.totalorder %s1337_s18, %s1337_s18 }
   0xc   :  { %p1344_p6 = por %p1343_p5, %p1342_p4 }
   0xe   :  { %p1345_p7 = pnand %p1344_p6, %p1338_p3 }
  0x10   :  { %1348 = shalt.err (!%p1345_p7)
}
  0x11   :  { %s1388_s19 = smov 128   ;;  %s1389_s20 = smov 8  }
  0x12   :  { %21 = dma.hbm_to_vmem [thread:$0]  %s1741_s0, 1024, %s16_s10, [#allocation3], %s1388_s19, %s1388_s19, %s1389_s20  }
  0x13   :  { %s1390_s23 = smov [#allocation5]   ;;  %s1349_s27 = scalar_lea.hbm %s1742_s1, 2048 }
  0x14   :  { %s27_s24 = sshll.u32 %s1390_s23, 4  ;;  %p1350_p8 = scmp.ne.s32.totalorder %s1742_s1, %s1349_s27  ;;  %s28_s24 = int_to_ptr.vmem [resolvable:$true] %s27_s24 }
  0x15   :  { %p1353_p9 = scmp.lt.u32.totalorder %s1349_s27, %s1742_s1 }
  0x17   :  { %p1355_p10 = pnand %p1353_p9, %p1350_p8 }
  0x19   :  { %1358 = shalt.err (!%p1355_p10)
}
  0x1a   :  { %s1359_s4 = scalar_lea.vmem %s28_s24, 2048  ;;  %p1364_p12 = scmp.lt.s32.totalorder %s28_s24, %s28_s24 }
  0x1b   :  { %p1360_p11 = scmp.ne.s32.totalorder %s28_s24, %s1359_s4  ;;  %p1365_p13 = scmp.lt.s32.totalorder %s1359_s4, %s1359_s4 }
  0x1d   :  { %p1366_p0 = por %p1365_p13, %p1364_p12 }
  0x1f   :  { %p1367_p1 = pnand %p1366_p0, %p1360_p11 }
  0x21   :  { %1370 = shalt.err (!%p1367_p1)
}
  0x22   :  { %33 = dma.hbm_to_vmem [thread:$0]  %s1742_s1, 2048, %s28_s24, [#allocation6], %s1388_s19, %s1388_s19, %s1389_s20  }
  0x23   :  { %1381 = dma.done.wait [#allocation3], 1024  }
  0x24   :  { %1382 = vsyncadd [#allocation3], 4294966272 }
  0x25   :  { %1383 = dma.done.wait [#allocation6], 2048  }
  0x26   :  { %1384 = vsyncadd [#allocation6], 4294965248  ;;  %v61_v0 = vld [vmem:[#allocation5] sm:$0xff]  ;;  %v62_v1 = vld [vmem:[#allocation5 + $0x8] sm:$0xff]  ;;  %s1371_s8 = scalar_lea.hbm %s1743_s2, 16 }
  0x27   :  { %v1431_v2 = vld [vmem:[#allocation5 + $0x10] sm:$0xff]  ;;  %v78_v3 = vand.u32 4294901760, %v61_v0  ;;  %v81_v4 = vand.u32 4294901760, %v62_v1  ;;  %v1433_v5 = vld [vmem:[#allocation5 + $0x18] sm:$0xff]  ;;  %v1436_v7 = vld [vmem:[#allocation5 + $0x20] sm:$0xff]  ;;  %p1372_p2 = scmp.ne.s32.totalorder %s1743_s2, %s1371_s8  ;;  %p1375_p3 = scmp.lt.u32.totalorder %s1371_s8, %s1743_s2 }
  0x28   :  { %v84_v6 = vand.u32 4294901760, %v1431_v2  ;;  %v1438_v8 = vld [vmem:[#allocation5 + $0x28] sm:$0xff]  ;;  %v87_v9 = vand.u32 4294901760, %v1433_v5  ;;  %v90_v11 = vand.u32 4294901760, %v1436_v7  ;;  %v1451_v14 = vld [vmem:[#allocation5 + $0x30] sm:$0xff]  ;;  %v1453_v15 = vld [vmem:[#allocation5 + $0x38] sm:$0xff] }
  0x29   :  { %v1441_v10 = vpack.c.bf16 %v81_v4, %v78_v3  ;;  %v93_v12 = vand.u32 4294901760, %v1438_v8  ;;  %v40_v16 = vld [vmem:[#allocation2] sm:$0xff]  ;;  %v43_v17 = vld [vmem:[#allocation2 + $0x10] sm:$0xff]  ;;  %v41_v20 = vld [vmem:[#allocation2 + $0x8] sm:$0xff]  ;;  %v96_v22 = vand.u32 4294901760, %v1451_v14  ;;  %v99_v23 = vand.u32 4294901760, %v1453_v15  ;;  %p1377_p4 = pnand %p1375_p3, %p1372_p2 }
  0x2a   :  { %v1449_v13 = vpack.c.bf16 %v87_v9, %v84_v6  ;;  %v45_v18 = vadd.f32 %v43_v17, %v40_v16  ;;  %v48_v19 = vld [vmem:[#allocation2 + $0x20] sm:$0xff]  ;;  %v53_v24 = vld [vmem:[#allocation2 + $0x30] sm:$0xff]  ;;  %v44_v25 = vld [vmem:[#allocation2 + $0x18] sm:$0xff]  ;;  %v1501_v44 = vsub.f32 %v61_v0, %v78_v3  ;;  %v1515_v49 = vsub.f32 %v62_v1, %v81_v4 }
  0x2b   :  { %1115 = vmatprep.subr.bf16.mxu1 %v1441_v10  ;;  %1211 = vmatprep.subr.bf16.mxu0 %v1441_v10  ;;  %v1465_v21 = vpack.c.bf16 %v93_v12, %v90_v11  ;;  %v49_v26 = vld [vmem:[#allocation2 + $0x28] sm:$0xff]  ;;  %v1469_v27 = vld [vmem:[#allocation5 + $0x40] sm:$0xff]  ;;  %v46_v30 = vadd.f32 %v44_v25, %v41_v20  ;;  %v54_v31 = vld [vmem:[#allocation2 + $0x38] sm:$0xff]  ;;  %v1481_v34 = vpack.c.bf16 %v99_v23, %v96_v22 }
  0x2c   :  { %1117 = vmatpush3.bf16.msra.mxu1 %v1441_v10  ;;  %1213 = vmatpush3.bf16.msra.mxu0 %v1441_v10  ;;  %v1471_v28 = vld [vmem:[#allocation5 + $0x48] sm:$0xff]  ;;  %v50_v29 = vadd.f32 %v48_v19, %v45_v18  ;;  %v102_v35 = vand.u32 4294901760, %v1469_v27  ;;  %v1485_v37 = vld [vmem:[#allocation5 + $0x50] sm:$0xff]  ;;  %v1487_v38 = vld [vmem:[#allocation5 + $0x58] sm:$0xff]  ;;  %v181_v56 = vand.u32 4294901760, %v1501_v44  ;;  %v188_v60 = vand.u32 4294901760, %v1515_v49 }
  0x2d   :  { %1119 = vmatprep.subr.bf16.mxu1 %v1449_v13  ;;  %1215 = vmatprep.subr.bf16.mxu0 %v1449_v13  ;;  %v51_v33 = vadd.f32 %v49_v26, %v46_v30  ;;  %v105_v36 = vand.u32 4294901760, %v1471_v28  ;;  %v1493_v41 = vld [vmem:[#allocation5 + $0x60] sm:$0xff]  ;;  %v1495_v42 = vld [vmem:[#allocation5 + $0x68] sm:$0xff]  ;;  %v108_v47 = vand.u32 4294901760, %v1485_v37  ;;  %v111_v48 = vand.u32 4294901760, %v1487_v38  ;;  %v1528_v54 = vld [vmem:[#allocation5 + $0x70] sm:$0xff] }
  0x2e   :  { %v55_v32 = vadd.f32 %v53_v24, %v50_v29  ;;  %v114_v52 = vand.u32 4294901760, %v1493_v41  ;;  %v117_v53 = vand.u32 4294901760, %v1495_v42  ;;  %v1546_v59 = vld [vmem:[#allocation5 + $0x78] sm:$0xff]  ;;  %v1552_v61 = vsub.f32 %v1431_v2, %v84_v6 }
  0x2f   :  { %v56_v40 = vadd.f32 %v54_v31, %v51_v33  ;;  %v1511_v46 = vpack.c.bf16 %v105_v36, %v102_v35  ;;  %v1544_v58 = vpack.c.bf16 %v111_v48, %v108_v47  ;;  %v1557_v62 = vsub.f32 %v1433_v5, %v87_v9 }
  0x30   :  { %1121 = vmatpush3.bf16.msra.mxu1 %v1449_v13  ;;  %1217 = vmatpush3.bf16.msra.mxu0 %v1449_v13  ;;  %v1489_v39 = vmul.f32 0.25, %v55_v32  ;;  %v1564_v0 = vpack.c.bf16 %v117_v53, %v114_v52  ;;  %v120_v1 = vand.u32 4294901760, %v1528_v54  ;;  %v123_v2 = vand.u32 4294901760, %v1546_v59 }
  0x31   :  { %1123 = vmatprep.subr.bf16.mxu1 %v1465_v21  ;;  %1219 = vmatprep.subr.bf16.mxu0 %v1465_v21  ;;  %v1503_v45 = vmul.f32 0.25, %v56_v40  ;;  %v182_v5 = vsub.f32 %v1501_v44, %v181_v56  ;;  %v1579_v6 = vsub.f32 %v1436_v7, %v90_v11  ;;  %v189_v9 = vsub.f32 %v1515_v49, %v188_v60 }
  0x32   :  { %v1499_v43 = vmul.f32 %v1489_v39, %v1489_v39  ;;  %v195_v16 = vand.u32 4294901760, %v1552_v61  ;;  %v202_v17 = vand.u32 4294901760, %v1557_v62  ;;  %v1589_v18 = vsub.f32 %v1438_v8, %v93_v12 }
  0x33   :  { %v1522_v51 = vmul.f32 %v1503_v45, %v1503_v45  ;;  %v1595_v11 = vsub.f32 %v1451_v14, %v96_v22  ;;  %v1603_v20 = vpack.c.bf16 %v123_v2, %v120_v1  ;;  %v183_v8 = vand.u32 4294901760, %v182_v5 }
  0x34   :  { %1125 = vmatpush3.bf16.msra.mxu1 %v1465_v21  ;;  %1221 = vmatpush3.bf16.msra.mxu0 %v1465_v21  ;;  %v1518_v50 = vand.u32 4294901760, %v1499_v43  ;;  %v209_v12 = vand.u32 4294901760, %v1579_v6  ;;  %v1609_v24 = vsub.f32 %v1453_v15, %v99_v23  ;;  %v190_v14 = vand.u32 4294901760, %v189_v9 }
  0x35   :  { %1127 = vmatprep.subr.bf16.mxu1 %v1481_v34  ;;  %1223 = vmatprep.subr.bf16.mxu0 %v1481_v34  ;;  %v1536_v57 = vand.u32 4294901760, %v1522_v51  ;;  %v196_v22 = vsub.f32 %v1552_v61, %v195_v16  ;;  %v203_v25 = vsub.f32 %v1557_v62, %v202_v17  ;;  %v216_v26 = vand.u32 4294901760, %v1589_v18 }
  0x36   :  { %v1532_v55 = vsub.f32 %v1499_v43, %v1518_v50  ;;  %v1242_v29 = vpack.c.bf16 %v188_v60, %v181_v56  ;;  %v223_v31 = vand.u32 4294901760, %v1595_v11  ;;  %v210_v15 = vsub.f32 %v1579_v6, %v209_v12 }
  0x37   :  { %v1569_v3 = vsub.f32 %v1522_v51, %v1536_v57  ;;  %v230_v23 = vand.u32 4294901760, %v1609_v24  ;;  %v1625_v32 = vsub.f32 %v1469_v27, %v102_v35  ;;  %v1630_v33 = vsub.f32 %v1471_v28, %v105_v36 }
  0x38   :  { %1129 = vmatpush3.bf16.msra.mxu1 %v1481_v34  ;;  %1225 = vmatpush3.bf16.msra.mxu0 %v1481_v34  ;;  %v160_v63 = vand.u32 4294901760, %v1532_v55  ;;  %v1146_v40 = vpack.c.bf16 %v190_v14, %v183_v8  ;;  %v197_v56 = vand.u32 4294901760, %v196_v22  ;;  %v204_v60 = vand.u32 4294901760, %v203_v25 }
  0x39   :  { %1131 = vmatprep.subr.bf16.mxu1 %v1511_v46  ;;  %1227 = vmatprep.subr.bf16.mxu0 %v1511_v46  ;;  %v170_v7 = vand.u32 4294901760, %v1569_v3  ;;  %v224_v5 = vsub.f32 %v1595_v11, %v223_v31  ;;  %v1639_v27 = vsub.f32 %v1485_v37, %v108_v47  ;;  %v1246_v28 = vpack.c.bf16 %v202_v17, %v195_v16 }
  0x3a   :  { %v161_v4 = vsub.f32 %v1532_v55, %v160_v63  ;;  %1041 = vmatprep.mubr.f32.mxu0 %v160_v63  ;;  %v217_v63 = vsub.f32 %v1589_v18, %v216_v26  ;;  %v231_v35 = vsub.f32 %v1609_v24, %v230_v23  ;;  %v237_v36 = vand.u32 4294901760, %v1625_v32 }
  0x3b   :  { %v171_v30 = vsub.f32 %v1569_v3, %v170_v7  ;;  %v244_v9 = vand.u32 4294901760, %v1630_v33  ;;  %v211_v8 = vand.u32 4294901760, %v210_v15  ;;  %v1649_v37 = vsub.f32 %v1487_v38, %v111_v48 }
  0x3c   :  { %1133 = vmatpush3.bf16.msra.mxu1 %v1511_v46  ;;  %1229 = vmatpush3.bf16.msra.mxu0 %v1511_v46  ;;  %v162_v19 = vand.u32 4294901760, %v161_v4  ;;  %v218_v14 = vand.u32 4294901760, %v217_v63  ;;  %v225_v47 = vand.u32 4294901760, %v224_v5  ;;  %v251_v16 = vand.u32 4294901760, %v1639_v27 }
  0x3d   :  { %1135 = vmatprep.subr.bf16.mxu1 %v1544_v58  ;;  %1231 = vmatprep.subr.bf16.mxu0 %v1544_v58  ;;  %v172_v4 = vand.u32 4294901760, %v171_v30  ;;  %v232_v17 = vand.u32 4294901760, %v231_v35  ;;  %v238_v22 = vsub.f32 %v1625_v32, %v237_v36  ;;  %v245_v25 = vsub.f32 %v1630_v33, %v244_v9 }
  0x3e   :  { %936 = vmatprep.mubr.f32.mxu1 %v162_v19  ;;  %v1150_v19 = vpack.c.bf16 %v204_v60, %v197_v56  ;;  %v1657_v30 = vsub.f32 %v1493_v41, %v114_v52  ;;  %v1154_v38 = vpack.c.bf16 %v218_v14, %v211_v8  ;;  %v1250_v48 = vpack.c.bf16 %v216_v26, %v209_v12 }
  0x3f   :  { %v1254_v15 = vpack.c.bf16 %v230_v23, %v223_v31  ;;  %v1158_v41 = vpack.c.bf16 %v232_v17, %v225_v47  ;;  %v239_v52 = vand.u32 4294901760, %v238_v22  ;;  %v246_v56 = vand.u32 4294901760, %v245_v25 }
  0x40   :  { %1137 = vmatpush3.bf16.msra.mxu1 %v1544_v58  ;;  %1233 = vmatpush3.bf16.msra.mxu0 %v1544_v58  ;;  %v265_v12 = vand.u32 4294901760, %v1657_v30  ;;  %v1679_v31 = vsub.f32 %v1546_v59, %v123_v2  ;;  %v1258_v60 = vpack.c.bf16 %v244_v9, %v237_v36  ;;  %v1178_v25 = vpack.c.bf16 %v1515_v49, %v1501_v44 }
  0x41   :  { %1139 = vmatprep.subr.bf16.mxu1 %v1564_v0  ;;  %1235 = vmatprep.subr.bf16.mxu0 %v1564_v0  ;;  %v1162_v23 = vpack.c.bf16 %v246_v56, %v239_v52  ;;  %v1186_v44 = vpack.c.bf16 %v1589_v18, %v1579_v6  ;;  %v1190_v49 = vpack.c.bf16 %v1609_v24, %v1595_v11 }
  0x44   :  { %1141 = vmatpush3.bf16.msra.mxu1 %v1564_v0  ;;  %1237 = vmatpush3.bf16.msra.mxu0 %v1564_v0 }
  0x45   :  { %1143 = vmatprep.subr.bf16.mxu1 %v1603_v20  ;;  %1239 = vmatprep.subr.bf16.mxu0 %v1603_v20 }
  0x48   :  { %1145 = vmatpush3.bf16.msra.mxu1 %v1603_v20  ;;  %1241 = vmatpush3.bf16.msra.mxu0 %v1603_v20 }
  0x49   :  { %1147 = vmatprep.subr.bf16.mxu1 %v1146_v40  ;;  %1243 = vmatprep.subr.bf16.mxu0 %v1242_v29 }
  0x4b   :  { %937 = vmatmul.mubr.f32.vlgmr.msra.gmra.mrb[0].mxu1 %v172_v4  ;;  %1042 = vmatmul.mubr.f32.vlgmr.msra.gmra.mrb[0].mxu0 %v170_v7  ;;  %v258_v7 = vand.u32 4294901760, %v1649_v37  ;;  %v266_v4 = vsub.f32 %v1657_v30, %v265_v12 }
  0x4c   :  { %1149 = vmatpush3.bf16.msra.mxu1 %v1146_v40  ;;  %1245 = vmatpush3.bf16.msra.mxu0 %v1242_v29  ;;  %v1663_v29 = vsub.f32 %v1495_v42, %v117_v53  ;;  %v252_v40 = vsub.f32 %v1639_v27, %v251_v16  ;;  %v1674_v53 = vsub.f32 %v1528_v54, %v120_v1  ;;  %v286_v1 = vand.u32 4294901760, %v1679_v31 }
  0x4d   :  { %1151 = vmatprep.subr.bf16.mxu1 %v1150_v19  ;;  %1247 = vmatprep.subr.bf16.mxu0 %v1246_v28  ;;  %v259_v26 = vsub.f32 %v1649_v37, %v258_v7  ;;  %v1262_v59 = vpack.c.bf16 %v258_v7, %v251_v16  ;;  %v267_v2 = vand.u32 4294901760, %v266_v4 }
  0x4e   :  { %971 = vmatprep.mubr.f32.mxu1 %v1518_v50  ;;  %1076 = vmatprep.mubr.f32.mxu0 %v1518_v50  ;;  %v272_v42 = vand.u32 4294901760, %v1663_v29  ;;  %v253_v63 = vand.u32 4294901760, %v252_v40  ;;  %v279_v54 = vand.u32 4294901760, %v1674_v53 }
  0x4f   :  { %v260_v5 = vand.u32 4294901760, %v259_v26 }
  0x50   :  { %1153 = vmatpush3.bf16.msra.mxu1 %v1150_v19  ;;  %1249 = vmatpush3.bf16.msra.mxu0 %v1246_v28  ;;  %v273_v28 = vsub.f32 %v1663_v29, %v272_v42  ;;  %v280_v9 = vsub.f32 %v1674_v53, %v279_v54  ;;  %v287_v19 = vsub.f32 %v1679_v31, %v286_v1 }
  0x51   :  { %1155 = vmatprep.subr.bf16.mxu1 %v1154_v38  ;;  %1251 = vmatprep.subr.bf16.mxu0 %v1250_v48  ;;  %v1166_v35 = vpack.c.bf16 %v260_v5, %v253_v63  ;;  %v1266_v14 = vpack.c.bf16 %v272_v42, %v265_v12  ;;  %v1270_v22 = vpack.c.bf16 %v286_v1, %v279_v54 }
  0x52   :  { %v274_v36 = vand.u32 4294901760, %v273_v28  ;;  %v281_v47 = vand.u32 4294901760, %v280_v9  ;;  %v288_v17 = vand.u32 4294901760, %v287_v19 }
  0x54   :  { %1157 = vmatpush3.bf16.msra.mxu1 %v1154_v38  ;;  %1253 = vmatpush3.bf16.msra.mxu0 %v1250_v48  ;;  %v1170_v8 = vpack.c.bf16 %v274_v36, %v267_v2  ;;  %v1174_v16 = vpack.c.bf16 %v288_v17, %v281_v47  ;;  %v1182_v38 = vpack.c.bf16 %v1557_v62, %v1552_v61 }
  0x55   :  { %1159 = vmatprep.subr.bf16.mxu1 %v1158_v41  ;;  %1255 = vmatprep.subr.bf16.mxu0 %v1254_v15 }
  0x58   :  { %1161 = vmatpush3.bf16.msra.mxu1 %v1158_v41  ;;  %1257 = vmatpush3.bf16.msra.mxu0 %v1254_v15 }
  0x59   :  { %1163 = vmatprep.subr.bf16.mxu1 %v1162_v23  ;;  %1259 = vmatprep.subr.bf16.mxu0 %v1258_v60 }
  0x5c   :  { %1165 = vmatpush3.bf16.msra.mxu1 %v1162_v23  ;;  %1261 = vmatpush3.bf16.msra.mxu0 %v1258_v60 }
  0x5d   :  { %1167 = vmatprep.subr.bf16.mxu1 %v1166_v35  ;;  %1263 = vmatprep.subr.bf16.mxu0 %v1262_v59 }
  0x60   :  { %1169 = vmatpush3.bf16.msra.mxu1 %v1166_v35  ;;  %1265 = vmatpush3.bf16.msra.mxu0 %v1262_v59 }
  0x61   :  { %1171 = vmatprep.subr.bf16.mxu1 %v1170_v8  ;;  %1267 = vmatprep.subr.bf16.mxu0 %v1266_v14 }
  0x64   :  { %1173 = vmatpush3.bf16.msra.mxu1 %v1170_v8  ;;  %1269 = vmatpush3.bf16.msra.mxu0 %v1266_v14 }
  0x65   :  { %1175 = vmatprep.subr.bf16.mxu1 %v1174_v16  ;;  %1271 = vmatprep.subr.bf16.mxu0 %v1270_v22 }
  0x68   :  { %1177 = vmatpush3.bf16.msra.mxu1 %v1174_v16  ;;  %1273 = vmatpush3.bf16.msra.mxu0 %v1270_v22 }
  0x69   :  { %1179 = vmatprep.subr.bf16.mxu1 %v1178_v25  ;;  %1275 = vmatprep.subr.bf16.mxu0 %v1441_v10 }
  0x6b   :  { %972 = vmatmul.mubr.f32.vlgmr.msra.gmra.mrb[0].mxu1 %v1536_v57  ;;  %1077 = vmatmul.mubr.f32.vlgmr.msra.gmra.mrb[0].mxu0 %v1536_v57 }
  0x6c   :  { %1181 = vmatpush3.bf16.msra.mxu1 %v1178_v25  ;;  %1277 = vmatpush3.bf16.msra.mxu0 %v1441_v10  ;;  %v1194_v10 = vpack.c.bf16 %v1630_v33, %v1625_v32 }
  0x6d   :  { %1183 = vmatprep.subr.bf16.mxu1 %v1182_v38  ;;  %1279 = vmatprep.subr.bf16.mxu0 %v1449_v13 }
  0x6e   :  { %1006 = vmatprep.mubr.f32.mxu1 %v1532_v55  ;;  %1111 = vmatprep.mubr.f32.mxu0 %v1518_v50 }
  0x70   :  { %1185 = vmatpush3.bf16.msra.mxu1 %v1182_v38  ;;  %1281 = vmatpush3.bf16.msra.mxu0 %v1449_v13  ;;  %v1198_v13 = vpack.c.bf16 %v1649_v37, %v1639_v27 }
  0x71   :  { %1187 = vmatprep.subr.bf16.mxu1 %v1186_v44  ;;  %1283 = vmatprep.subr.bf16.mxu0 %v1465_v21 }
  0x74   :  { %1189 = vmatpush3.bf16.msra.mxu1 %v1186_v44  ;;  %1285 = vmatpush3.bf16.msra.mxu0 %v1465_v21  ;;  %v1202_v21 = vpack.c.bf16 %v1663_v29, %v1657_v30 }
  0x75   :  { %1191 = vmatprep.subr.bf16.mxu1 %v1190_v49  ;;  %1287 = vmatprep.subr.bf16.mxu0 %v1481_v34 }
  0x78   :  { %1193 = vmatpush3.bf16.msra.mxu1 %v1190_v49  ;;  %1289 = vmatpush3.bf16.msra.mxu0 %v1481_v34  ;;  %v1206_v34 = vpack.c.bf16 %v1679_v31, %v1674_v53 }
  0x79   :  { %1195 = vmatprep.subr.bf16.mxu1 %v1194_v10  ;;  %1291 = vmatprep.subr.bf16.mxu0 %v1511_v46 }
  0x7c   :  { %1197 = vmatpush3.bf16.msra.mxu1 %v1194_v10  ;;  %1293 = vmatpush3.bf16.msra.mxu0 %v1511_v46 }
  0x7d   :  { %1199 = vmatprep.subr.bf16.mxu1 %v1198_v13  ;;  %1295 = vmatprep.subr.bf16.mxu0 %v1544_v58 }
  0x80   :  { %1201 = vmatpush3.bf16.msra.mxu1 %v1198_v13  ;;  %1297 = vmatpush3.bf16.msra.mxu0 %v1544_v58 }
  0x81   :  { %1203 = vmatprep.subr.bf16.mxu1 %v1202_v21  ;;  %1299 = vmatprep.subr.bf16.mxu0 %v1564_v0 }
  0x84   :  { %1205 = vmatpush3.bf16.msra.mxu1 %v1202_v21  ;;  %1301 = vmatpush3.bf16.msra.mxu0 %v1564_v0 }
  0x85   :  { %1207 = vmatprep.subr.bf16.mxu1 %v1206_v34  ;;  %1303 = vmatprep.subr.bf16.mxu0 %v1603_v20 }
  0x88   :  { %1209 = vmatpush3.bf16.msra.mxu1 %v1206_v34  ;;  %1305 = vmatpush3.bf16.msra.mxu0 %v1603_v20 }
  0x8b   :  { %1007 = vmatmul.mubr.f32.vlgmr.msra.gmra.mrb[0].mxu1 %v1569_v3  ;;  %1112 = vmatmul.mubr.f32.vlgmr.msra.gmra.mrb[0].mxu0 %v1536_v57 }
 0x15e   :  { %v1008_v46 = vpop.f32.mrb[0].mxu1  ;;  %v1113_v50 = vpop.f32.mrb[0].mxu0 }
 0x15f   :  { %v1306_v55 = vadd.f32 %v1113_v50, %v1008_v46  ;;  %v435_v58 = vpop.f32.mrb[1].mxu1  ;;  %v751_v61 = vpop.f32.mrb[1].mxu0 }
 0x160   :  { %v1307_v62 = vadd.f32 %v751_v61, %v435_v58 }
 0x161   :  { %1323 = vrcp.f32 %v1306_v55 }
 0x162   :  { %1325 = vrcp.f32 %v1307_v62 }
 0x16b   :  { %v1324_v6 = vpop.eup %1323 }
 0x16c   :  { %v1326_v0 = vpop.eup %1325  ;;  %v764_v18 = vmul.f32 %v1324_v6, %v1522_v51 }
 0x16d   :  { %v763_v11 = vmul.f32 %v1326_v0, %v1499_v43 }
 0x16e   :  { %v766_v20 = vsub.f32 %v764_v18, %v1503_v45 }
 0x16f   :  { %v765_v3 = vsub.f32 %v763_v11, %v1489_v39 }
 0x170   :  { %v768_v24 = vmul.f32 %v766_v20, %v766_v20 }
 0x171   :  { %v767_v57 = vmul.f32 %v765_v3, %v765_v3 }
 0x173   :  { %v769_v32 = vadd.f32 %v768_v24, %v767_v57 }
 0x175   :  { %770 = vadd.xlane.f32.xlu0 %v769_v32 }
 0x202   :  { %v771_v33 = vpop.xlane.xlu0 %770 }
 0x203   :  { %v772_v27 = vrot.slane %v771_v33, 4 }
 0x205   :  { %v773_v37 = vadd.f32 %v772_v27, %v771_v33 }
 0x207   :  { %v774_v30 = vrot.slane %v773_v37, 2 }
 0x209   :  { %v775_v48 = vadd.f32 %v774_v30, %v773_v37 }
 0x20b   :  { %v776_v7 = vrot.slane %v775_v48, 1 }
 0x20d   :  { %v777_v29 = vadd.f32 %v776_v7, %v775_v48 }
 0x20f   :  { %1316 = vpush %v777_v29 }
 0x240   :  { %s1317_s1 = spop %1316 }
 0x241   :  { %780 = sst [smem:[#allocation7]] %s1317_s1 }
 0x242   :  { %1380 = shalt.err (!%p1377_p4)
}
 0x243   :  { %s1391_s13 = smov [#allocation7]  }
 0x244   :  { %788 = dma.smem_to_hbm %s1391_s13, 16, %s1743_s2, [#allocation4]  }
 0x245   :  { %1385 = dma.done.wait [#allocation4], 16  }
 0x246   :  { %1386 = vsyncadd [#allocation4], 4294967280 }
 0x247   :  { %792 = sfence }
 0x248   :  { %793 = vsyncpa [#allocation3], 1 }
 0x249   :  { %794 = vsyncpa [#allocation6], 1 }
 0x24a   :  { %795 = vsyncpa [#allocation4], 1 }

</bundles_post_ra>
